<compile_context>
chip_gen: v7x
topology: tpu7x:2x2x1
jax: 0.10.0
libtpu: 0.0.40
codegen_flags: <defaults>
</compile_context>

<pallas_src>
import functools

import jax
import jax.numpy as jnp
from jax.experimental import pallas as pl
from jax.experimental.pallas import tpu as pltpu


def _round_up(x: int, m: int) -> int:
    return ((x + m - 1) // m) * m


def _cdiv(a: int, b: int) -> int:
    return -(-a // b)


_VMEM_CAP = None          # cached per-process chip VMEM budget
_PIPELINE_MODE_OK = True  # set False if pl.Buffered / pipeline_mode is rejected


def _vmem_cap_bytes() -> int:
    """Usable VMEM budget with headroom, derived from the actual chip."""
    global _VMEM_CAP
    if _VMEM_CAP is None:
        try:
            phys = int(pltpu.get_tpu_info().vmem_capacity_bytes)
        except Exception:
            phys = 64 << 20  # conservative: assume v7x-sized (64 MiB) VMEM
        _VMEM_CAP = max(min(int(phys * 0.85), phys - (8 << 20)), 16 << 20)
    return _VMEM_CAP


def _router_kernel(x_ref, u_ref, v_ref, o_ref, h_ref):
    # x_ref: (TM, H)  u_ref: (H, Rp)  v_ref: (Rp, TN)  o_ref: (TM, TN)
    # h_ref: (TM, Rp) VMEM scratch, persists across the N-tile (j) axis.
    @pl.when(pl.program_id(1) == 0)
    def _():
        h = jnp.dot(x_ref[...], u_ref[...], preferred_element_type=jnp.float32)
        h_ref[...] = h.astype(h_ref.dtype)

    o_ref[...] = jnp.dot(
        h_ref[...], v_ref[...], preferred_element_type=jnp.float32
    ).astype(o_ref.dtype)


@functools.partial(
    jax.jit,
    static_argnames=("tm", "tn", "m_pad", "n_pad", "n_out",
                     "n_u_buf", "n_v_buf", "vmem_limit"))
def _forward_impl(x, Up, Vp, *, tm, tn, m_pad, n_pad, n_out,
                  n_u_buf, n_v_buf, vmem_limit):
    B, S, H = x.shape
    R_pad = Up.shape[1]
    M = B * S

    x2d = x.reshape(M, H)
    if m_pad != M:
        x2d = jnp.pad(x2d, ((0, m_pad - M), (0, 0)))

    h_dtype = jnp.bfloat16 if Vp.dtype == jnp.bfloat16 else jnp.float32
    grid = (m_pad // tm, n_pad // tn)
    n_m, n_n = grid

    def _spec(shape, index_map, bufs):
        if bufs == 2:  # default double buffering
            return pl.BlockSpec(shape, index_map)
        return pl.BlockSpec(shape, index_map, pipeline_mode=pl.Buffered(bufs))

    in_specs = [
        # token tile of activations (changes only with i -> fetched once per i)
        pl.BlockSpec((tm, H), lambda i, j: (i, 0)),
        # U resident across the whole grid (single-buffered when supported)
        _spec((H, R_pad), lambda i, j: (0, 0), n_u_buf),
        # V: resident (n_n == 1) or streamed one N-tile at a time
        _spec((R_pad, tn), lambda i, j: (0, j), n_v_buf),
    ]
    out_spec = pl.BlockSpec((tm, tn), lambda i, j: (i, j))

    # Accurate HBM traffic for the scheduler: V is re-streamed once per token
    # tile in the tiled-N path, read exactly once when resident.
    v_reads = n_m if n_n > 1 else 1
    flops = 2 * m_pad * (H * R_pad + R_pad * n_pad)
    bytes_accessed = int(
        m_pad * H * x2d.dtype.itemsize
        + Up.size * Up.dtype.itemsize
        + v_reads * Vp.size * Vp.dtype.itemsize
        + m_pad * n_pad * x2d.dtype.itemsize)
    cost = pl.CostEstimate(flops=int(flops), transcendentals=0,
                           bytes_accessed=bytes_accessed)

    out = pl.pallas_call(
        _router_kernel,
        out_shape=jax.ShapeDtypeStruct((m_pad, n_pad), x.dtype),
        grid_spec=pltpu.PrefetchScalarGridSpec(
            num_scalar_prefetch=0,
            grid=grid,
            in_specs=in_specs,
            out_specs=out_spec,
            scratch_shapes=[pltpu.VMEM((tm, R_pad), h_dtype)],
        ),
        compiler_params=pltpu.CompilerParams(
            dimension_semantics=("parallel", "arbitrary"),
            vmem_limit_bytes=int(vmem_limit),
        ),
        cost_estimate=cost,
    )(x2d, Up, Vp)

    return out[:M, :n_out].reshape(B, S, n_out)


def sparse_predictor_forward(x, U, V, *, tile_m=512, tile_n=512):
    """x: [batch, seq, hidden] -> logits: [batch, seq, intermediate]."""
    global _PIPELINE_MODE_OK

    B, S, H = x.shape
    H_u, R = U.shape
    R_v, N = V.shape
    assert H_u == H and R_v == R
    M = B * S

    # Sublane multiple: 16 for sub-32-bit activations (bf16), 8 for f32.
    sub = 16 if jnp.dtype(x.dtype).itemsize < 4 else 8

    R_pad = _round_up(R, 128)
    # NOTE: in production pre-pad U/V once at weight-load time; this pad is only
    # emitted when the rank is lane-misaligned.
    Up = U if R_pad == R else jnp.pad(U, ((0, 0), (0, R_pad - R)))

    N_full = _round_up(N, 128)

    # Token tile: big (default 512) for V reuse, clamped for tiny inputs, and
    # split so the parallel M axis yields >= 2 tiles when possible (megacore).
    tm = min(_round_up(tile_m, sub), _round_up(M, sub))
    if M > sub and _cdiv(M, tm) < 2:
        tm = _round_up(_cdiv(M, 2), sub)
    m_pad = _round_up(M, tm)

    cap = _vmem_cap_bytes()
    xb = jnp.dtype(x.dtype).itemsize
    wb = jnp.dtype(U.dtype).itemsize
    hb = 2 if jnp.dtype(V.dtype) == jnp.bfloat16 else 4

    def vmem_need(tn_, n_u, n_v):
        return (2 * tm * H * xb            # x tile (double-buffered, varies with i)
                + n_u * H * R_pad * wb     # resident U
                + n_v * R_pad * tn_ * wb   # V buffers
                + 2 * tm * tn_ * xb        # output tile
                + tm * R_pad * hb          # h scratch
                + (2 << 20))               # compiler-internal scratch slack

    def choose(allow_pm):
        n_u = 1 if allow_pm else 2
        n_v_res = 1 if allow_pm else 2
        # V-resident fast path (typically 128 MiB v5e/v6e parts): V is DMA'd
        # from HBM exactly once instead of once per token tile.
        if vmem_need(N_full, n_u, n_v_res) <= cap:
            return N_full, N_full, n_u, n_v_res
        # Streamed-V path (typically v7x 64 MiB): prefer triple-buffered V to
        # hide the longer j == 0 step; shrink tn (not tm) under VMEM pressure.
        for n_v in ((3, 2) if allow_pm else (2,)):
            tn_ = min(_round_up(tile_n, 128), N_full)
            while tn_ > 128 and vmem_need(tn_, n_u, n_v) > cap:
                tn_ -= 128
            if vmem_need(tn_, n_u, n_v) <= cap:
                return tn_, _round_up(N, tn_), n_u, n_v
        # Nothing fits cleanly (huge resident U): let the compiler try anyway.
        return 128, _round_up(N, 128), n_u, 2

    def _run(allow_pm):
        tn, n_pad, n_u, n_v = choose(allow_pm)
        Vp = V
        if R_pad != R or n_pad != N:
            Vp = jnp.pad(V, ((0, R_pad - R), (0, n_pad - N)))
        return _forward_impl(x, Up, Vp, tm=tm, tn=tn, m_pad=m_pad, n_pad=n_pad,
                             n_out=N, n_u_buf=n_u, n_v_buf=n_v, vmem_limit=cap)

    if _PIPELINE_MODE_OK:
        try:
            return _run(True)
        except Exception:
            # pipeline_mode / pl.Buffered not supported (or VMEM plan rejected):
            # fall back to default double-buffering everywhere.
            _PIPELINE_MODE_OK = False
    return _run(False)


def reference_forward(x, U, V):
    return jnp.einsum(
        "bsh,hr,rn->bsn",
        x.astype(jnp.float32), U.astype(jnp.float32), V.astype(jnp.float32),
    ).astype(x.dtype)


def _make_inputs(key, batch, seq, hidden, rank, inter, dtype):
    kx, ku, kv = jax.random.split(key, 3)
    x = jax.random.normal(kx, (batch, seq, hidden), dtype=jnp.float32)
    U = jax.random.normal(ku, (hidden, rank), dtype=jnp.float32) / jnp.sqrt(
        jnp.float32(hidden))
    V = jax.random.normal(kv, (rank, inter), dtype=jnp.float32) / jnp.sqrt(
        jnp.float32(rank))
    return x.astype(dtype), U.astype(dtype), V.astype(dtype)


if __name__ == "__main__":
    key = jax.random.PRNGKey(0)
    k1, k2, k3 = jax.random.split(key, 3)

    # 1) Small f32 case (rank/inter padded to lane multiples internally).
    batch, seq, hidden, rank, inter = 2, 8, 32, 8, 64
    x, U, V = _make_inputs(k1, batch, seq, hidden, rank, inter, jnp.float32)
    y = sparse_predictor_forward(x, U, V)
    jax.block_until_ready(y)
    y_ref = reference_forward(x, U, V)
    assert y.shape == (batch, seq, inter)
    assert jnp.allclose(y, y_ref, atol=1e-5, rtol=1e-5)

    # 2) Ragged token count (exercises M padding / multi-tile parallel M axis).
    x2, U2, V2 = _make_inputs(k2, 3, 10, 32, 8, 64, jnp.float32)
    y2 = sparse_predictor_forward(x2, U2, V2)
    jax.block_until_ready(y2)
    assert jnp.allclose(y2, reference_forward(x2, U2, V2), atol=1e-5, rtol=1e-5)

    # 3) bf16 weights/activations (bf16 h scratch + 16-sublane tiles).
    x3, U3, V3 = _make_inputs(k3, 2, 8, 32, 8, 64, jnp.bfloat16)
    y3 = sparse_predictor_forward(x3, U3, V3)
    jax.block_until_ready(y3)
    ref3 = jnp.einsum("bsh,hr,rn->bsn", x3.astype(jnp.float32),
                      U3.astype(jnp.float32), V3.astype(jnp.float32))
    assert jnp.allclose(y3.astype(jnp.float32), ref3, atol=1e-1, rtol=1e-1)

    print("KERNEL_OK")
</pallas_src>

<mosaic_0001>
module attributes {stable_mosaic.version = 11 : i64} {
  func.func @_router_kernel(%arg0: i32, %arg1: i32, %arg2: memref<8x32xf32, #tpu.memory_space<vmem>>, %arg3: memref<32x128xf32, #tpu.memory_space<vmem>>, %arg4: memref<128x128xf32, #tpu.memory_space<vmem>>, %arg5: memref<8x128xf32, #tpu.memory_space<vmem>>, %arg6: memref<8x128xf32, #tpu.memory_space<vmem>>) attributes {dimension_semantics = [#tpu.dimension_semantics<parallel>, #tpu.dimension_semantics<arbitrary>], iteration_bounds = array<i64: 2, 1>, scalar_prefetch = 0 : i64, scratch_operands = 1 : i64, tpu.core_type = #tpu.core_type<tc>, window_params = [{transform_indices = @transform_0, window_bounds = array<i64: 8, 32>}, {pipeline_mode = #tpu.pipeline_mode<synchronous>, transform_indices = @transform_1, window_bounds = array<i64: 32, 128>}, {pipeline_mode = #tpu.pipeline_mode<synchronous>, transform_indices = @transform_2, window_bounds = array<i64: 128, 128>}, {transform_indices = @transform_3, window_bounds = array<i64: 8, 128>}]} {
    %c0_i32 = arith.constant 0 : i32
    %0 = arith.cmpi eq, %arg1, %c0_i32 : i32
    %1 = arith.extui %0 : i1 to i32
    %c0_i32_0 = arith.constant 0 : i32
    %2 = arith.cmpi ne, %1, %c0_i32_0 : i32
    scf.if %2 {
      %c0_6 = arith.constant 0 : index
      %c0_7 = arith.constant 0 : index
      %7 = vector.load %arg2[%c0_6, %c0_7] : memref<8x32xf32, #tpu.memory_space<vmem>>, vector<8x32xf32>
      %c0_8 = arith.constant 0 : index
      %c0_9 = arith.constant 0 : index
      %8 = vector.load %arg3[%c0_8, %c0_9] : memref<32x128xf32, #tpu.memory_space<vmem>>, vector<32x128xf32>
      %cst_10 = arith.constant dense<0.000000e+00> : vector<8x128xf32>
      %9 = tpu.matmul %7, %8, %cst_10 {dimension_numbers = #tpu.dot_dimension_numbers<[1], [0], [0], [1], [0, 0, 1, 1], [], []>} : vector<8x32xf32>, vector<32x128xf32>, vector<8x128xf32> -> vector<8x128xf32>
      %c0_11 = arith.constant 0 : index
      %c0_12 = arith.constant 0 : index
      %10 = vector.load %arg6[%c0_11, %c0_12] : memref<8x128xf32, #tpu.memory_space<vmem>>, vector<8x128xf32>
      tpu.vector_store %arg6[%c0_11, %c0_12], %9 {strides = array<i32>} : memref<8x128xf32, #tpu.memory_space<vmem>>, vector<8x128xf32>,
    } else {
    }
    %c0 = arith.constant 0 : index
    %c0_1 = arith.constant 0 : index
    %3 = vector.load %arg6[%c0, %c0_1] : memref<8x128xf32, #tpu.memory_space<vmem>>, vector<8x128xf32>
    %c0_2 = arith.constant 0 : index
    %c0_3 = arith.constant 0 : index
    %4 = vector.load %arg4[%c0_2, %c0_3] : memref<128x128xf32, #tpu.memory_space<vmem>>, vector<128x128xf32>
    %cst = arith.constant dense<0.000000e+00> : vector<8x128xf32>
    %5 = tpu.matmul %3, %4, %cst {dimension_numbers = #tpu.dot_dimension_numbers<[1], [0], [0], [1], [0, 0, 1, 1], [], []>} : vector<8x128xf32>, vector<128x128xf32>, vector<8x128xf32> -> vector<8x128xf32>
    %c0_4 = arith.constant 0 : index
    %c0_5 = arith.constant 0 : index
    %6 = vector.load %arg5[%c0_4, %c0_5] : memref<8x128xf32, #tpu.memory_space<vmem>>, vector<8x128xf32>
    tpu.vector_store %arg5[%c0_4, %c0_5], %5 {strides = array<i32>} : memref<8x128xf32, #tpu.memory_space<vmem>>, vector<8x128xf32>,
    return
  }
  func.func @transform_0(%arg0: i32, %arg1: i32) -> (i32, i32) {
    %c0_i32 = arith.constant 0 : i32
    %c0_i32_0 = arith.constant 0 : i32
    return %arg0, %c0_i32 : i32, i32
  }
  func.func @transform_1(%arg0: i32, %arg1: i32) -> (i32, i32) {
    %c0_i32 = arith.constant 0 : i32
    %c0_i32_0 = arith.constant 0 : i32
    %c0_i32_1 = arith.constant 0 : i32
    return %c0_i32, %c0_i32_0 : i32, i32
  }
  func.func @transform_2(%arg0: i32, %arg1: i32) -> (i32, i32) {
    %c0_i32 = arith.constant 0 : i32
    %c0_i32_0 = arith.constant 0 : i32
    return %c0_i32, %arg1 : i32, i32
  }
  func.func @transform_3(%arg0: i32, %arg1: i32) -> (i32, i32) {
    %c0_i32 = arith.constant 0 : i32
    return %arg0, %arg1 : i32, i32
  }
}

module attributes {stable_mosaic.version = 11 : i64} {
  func.func @_router_kernel(%arg0: i32, %arg1: i32, %arg2: memref<8x32xf32, #tpu.memory_space<vmem>>, %arg3: memref<32x128xf32, #tpu.memory_space<vmem>>, %arg4: memref<128x128xf32, #tpu.memory_space<vmem>>, %arg5: memref<8x128xf32, #tpu.memory_space<vmem>>, %arg6: memref<8x128xf32, #tpu.memory_space<vmem>>) attributes {dimension_semantics = [#tpu.dimension_semantics<parallel>, #tpu.dimension_semantics<arbitrary>], iteration_bounds = array<i64: 2, 1>, scalar_prefetch = 0 : i64, scratch_operands = 1 : i64, tpu.core_type = #tpu.core_type<tc>, window_params = [{transform_indices = @transform_0, window_bounds = array<i64: 8, 32>}, {pipeline_mode = #tpu.pipeline_mode<synchronous>, transform_indices = @transform_1, window_bounds = array<i64: 32, 128>}, {transform_indices = @transform_2, window_bounds = array<i64: 128, 128>}, {transform_indices = @transform_3, window_bounds = array<i64: 8, 128>}]} {
    %c0_i32 = arith.constant 0 : i32
    %0 = arith.cmpi eq, %arg1, %c0_i32 : i32
    %1 = arith.extui %0 : i1 to i32
    %c0_i32_0 = arith.constant 0 : i32
    %2 = arith.cmpi ne, %1, %c0_i32_0 : i32
    scf.if %2 {
      %c0_6 = arith.constant 0 : index
      %c0_7 = arith.constant 0 : index
      %7 = vector.load %arg2[%c0_6, %c0_7] : memref<8x32xf32, #tpu.memory_space<vmem>>, vector<8x32xf32>
      %c0_8 = arith.constant 0 : index
      %c0_9 = arith.constant 0 : index
      %8 = vector.load %arg3[%c0_8, %c0_9] : memref<32x128xf32, #tpu.memory_space<vmem>>, vector<32x128xf32>
      %cst_10 = arith.constant dense<0.000000e+00> : vector<8x128xf32>
      %9 = tpu.matmul %7, %8, %cst_10 {dimension_numbers = #tpu.dot_dimension_numbers<[1], [0], [0], [1], [0, 0, 1, 1], [], []>} : vector<8x32xf32>, vector<32x128xf32>, vector<8x128xf32> -> vector<8x128xf32>
      %c0_11 = arith.constant 0 : index
      %c0_12 = arith.constant 0 : index
      %10 = vector.load %arg6[%c0_11, %c0_12] : memref<8x128xf32, #tpu.memory_space<vmem>>, vector<8x128xf32>
      tpu.vector_store %arg6[%c0_11, %c0_12], %9 {strides = array<i32>} : memref<8x128xf32, #tpu.memory_space<vmem>>, vector<8x128xf32>,
    } else {
    }
    %c0 = arith.constant 0 : index
    %c0_1 = arith.constant 0 : index
    %3 = vector.load %arg6[%c0, %c0_1] : memref<8x128xf32, #tpu.memory_space<vmem>>, vector<8x128xf32>
    %c0_2 = arith.constant 0 : index
    %c0_3 = arith.constant 0 : index
    %4 = vector.load %arg4[%c0_2, %c0_3] : memref<128x128xf32, #tpu.memory_space<vmem>>, vector<128x128xf32>
    %cst = arith.constant dense<0.000000e+00> : vector<8x128xf32>
    %5 = tpu.matmul %3, %4, %cst {dimension_numbers = #tpu.dot_dimension_numbers<[1], [0], [0], [1], [0, 0, 1, 1], [], []>} : vector<8x128xf32>, vector<128x128xf32>, vector<8x128xf32> -> vector<8x128xf32>
    %c0_4 = arith.constant 0 : index
    %c0_5 = arith.constant 0 : index
    %6 = vector.load %arg5[%c0_4, %c0_5] : memref<8x128xf32, #tpu.memory_space<vmem>>, vector<8x128xf32>
    tpu.vector_store %arg5[%c0_4, %c0_5], %5 {strides = array<i32>} : memref<8x128xf32, #tpu.memory_space<vmem>>, vector<8x128xf32>,
    return
  }
  func.func @transform_0(%arg0: i32, %arg1: i32) -> (i32, i32) {
    %c0_i32 = arith.constant 0 : i32
    %c0_i32_0 = arith.constant 0 : i32
    return %arg0, %c0_i32 : i32, i32
  }
  func.func @transform_1(%arg0: i32, %arg1: i32) -> (i32, i32) {
    %c0_i32 = arith.constant 0 : i32
    %c0_i32_0 = arith.constant 0 : i32
    %c0_i32_1 = arith.constant 0 : i32
    return %c0_i32, %c0_i32_0 : i32, i32
  }
  func.func @transform_2(%arg0: i32, %arg1: i32) -> (i32, i32) {
    %c0_i32 = arith.constant 0 : i32
    %c0_i32_0 = arith.constant 0 : i32
    return %c0_i32, %arg1 : i32, i32
  }
  func.func @transform_3(%arg0: i32, %arg1: i32) -> (i32, i32) {
    %c0_i32 = arith.constant 0 : i32
    return %arg0, %arg1 : i32, i32
  }
}

</mosaic_0001>

<bundles_post_ra>
// kernel: _forward_impl.1
= control target key start
LH: loop header
LB: loop body
LE: loop exit
PB: predicated region body
PF: predicated region fallthrough
CT: control target
= control target key end

     0   :  { %8 = vsyncpa [#allocation4], 0  ;;  %s1078_s0 = inlined_call_operand.hbm [shape: f32[16,32], index: 0, kind: input, shape index: {}]   ;;  %s1079_s1 = inlined_call_operand.hbm [shape: f32[32,128], index: 1, kind: input, shape index: {}]   ;;  %s1080_s2 = inlined_call_operand.hbm [shape: f32[128,128], index: 2, kind: input, shape index: {}]   ;;  %s1081_s3 = inlined_call_operand.vmem [shape: f32[16,128], index: 3, kind: output, shape index: {}]  }
   0x1   :  { %10 = vsyncpa [#allocation4 + $0x1], 0 }
   0x2   :  { %11 = vsyncpa [#allocation6], 0  ;;  %s883_s12 = smov 0   ;;  %s885_s13 = smov 0  }
   0x3   :  { %s887_s14 = smov 0   ;;  %s889_s15 = smov 0  }
   0x4   :  { %s891_s16 = smov 0   ;;  %s893_s17 = smov 0  }
   0x5 LB: > { %s518_s18 = sadd.s32 4294967295, %s853_s17   ;;  %p49_p0 = scmp.ne.s32.totalorder %s837_s13, %s833_s12  ;;  %s853_s17 = sphi %s893_s17, %s17_s17   ;;  %s849_s16 = sphi %s891_s16, %s1099_s16   ;;  %s845_s15 = sphi %s889_s15, %s1098_s15   ;;  %s841_s14 = sphi %s887_s14, %s1097_s14   ;;  %s837_s13 = sphi %s885_s13, %s1096_s13   ;;  %s833_s12 = sphi %s883_s12, %s1095_s12  }
   0x6   : > { %p913_p1 = scmp.eq.s32.totalorder %s518_s18, 0  ;;  %p520_p2 = scmp.ge.s32.totalorder %s853_s17, 1 }
   0x7   : > { %p135_p3 = scmp.lt.s32.totalorder %s853_s17, 3  ;;  %s855_s22 = smov [#allocation5]  }
   0x8   : > { %s1086_s19 = scalar_select %p913_p1, 1, 0 }
   0x9   : > { %p921_p4 = por %p913_p1, %p49_p0  ;;  %p925_p5 = pnand %p520_p2, %p135_p3 }
   0xa   : > { %s147_s23 = sshll.u32 %s855_s22, 4  ;;  %s856_s25 = smov [#allocation7]   ;;  %s148_s23 = int_to_ptr.vmem [resolvable:$true] %s147_s23 }
   0xb   : > { %s1087_s20 = scalar_select %p921_p4, 1, 0 }
   0xc   : > { %s1088_s21 = scalar_select %p925_p5, 1, 0 }
   0xd   : > { %p642_p6 = pneg %p925_p5  ;;  %s162_s26 = sshll.u32 %s856_s25, 4  ;;  %s937_s26 = int_to_ptr.vmem [resolvable:$true] %s162_s26 }
   0xe   : > { %s713_s29 = scalar_lea.hbm %s1079_s1, 512 }
   0xf   : > { %p933_p7 = pnand %p642_p6, %p913_p1  ;;  %p714_p8 = scmp.ne.s32.totalorder %s1079_s1, %s713_s29 }
  0x10   : > { %p720_p12 = scmp.lt.u32.totalorder %s713_s29, %s1079_s1 }
  0x11   : > { %p715_p9 = pneg %p933_p7 }
  0x13   : > { %p716_p10 = pnand %p715_p9, %p714_p8 }
  0x15   : > { %p717_p11 = pneg %p716_p10 }
  0x17   : > { %p722_p13 = pnand %p720_p12, %p717_p11 }
  0x19   : > { %725 = shalt.err (!%p722_p13)
}
  0x1a   : > { %s726_s7 = scalar_lea.vmem %s148_s23, 512  ;;  %p734_p6 = scmp.lt.s32.totalorder %s148_s23, %s148_s23 }
  0x1b   : > { %p727_p0 = scmp.ne.s32.totalorder %s148_s23, %s726_s7  ;;  %p735_p1 = scmp.lt.s32.totalorder %s726_s7, %s726_s7 }
  0x1d   : > { %p729_p2 = pnand %p727_p0, %p715_p9  ;;  %p736_p4 = por %p735_p1, %p734_p6 }
  0x1f   : > { %p730_p3 = pneg %p729_p2 }
  0x21   : > { %p737_p5 = pnand %p736_p4, %p730_p3 }
  0x23   : > { %740 = shalt.err (!%p737_p5)
}
  0x24   : > { %s857_s8 = smov 128   ;;  %s858_s9 = smov 8  }
  0x25   : > { %645 = dma.hbm_to_vmem [thread:$0]  (!%p933_p7), %s1079_s1, 512, %s148_s23, [#allocation6], %s857_s8, %s857_s8, %s858_s9  }
  0x26   : > { %s741_s22 = scalar_lea.hbm %s1080_s2, 2048 }
  0x27   : > { %p742_p8 = scmp.ne.s32.totalorder %s1080_s2, %s741_s22  ;;  %p748_p5 = scmp.lt.u32.totalorder %s741_s22, %s1080_s2 }
  0x29   : > { %p744_p1 = pnand %p742_p8, %p715_p9 }
  0x2b   : > { %p745_p4 = pneg %p744_p1 }
  0x2d   : > { %p750_p10 = pnand %p748_p5, %p745_p4 }
  0x2f   : > { %753 = shalt.err (!%p750_p10)
}
  0x30   : > { %s754_s23 = scalar_lea.vmem %s937_s26, 2048  ;;  %p762_p0 = scmp.lt.s32.totalorder %s937_s26, %s937_s26 }
  0x31   : > { %p755_p11 = scmp.ne.s32.totalorder %s937_s26, %s754_s23  ;;  %p763_p2 = scmp.lt.s32.totalorder %s754_s23, %s754_s23 }
  0x33   : > { %p757_p12 = pnand %p755_p11, %p715_p9  ;;  %p764_p3 = por %p763_p2, %p762_p0 }
  0x35   : > { %p758_p13 = pneg %p757_p12 }
  0x37   : > { %p765_p6 = pnand %p764_p3, %p758_p13 }
  0x39   : > { %768 = shalt.err (!%p765_p6)
}
  0x3a   : > { %648 = dma.hbm_to_vmem [thread:$0]  (!%p933_p7), %s1080_s2, 2048, %s937_s26, [#allocation6], %s857_s8, %s857_s8, %s858_s9  }
  0x3b   : > { %s29_s5 = sadd.s32 1, %s849_s16  ;;  %s36_s6 = sadd.s32 1, %s841_s14 }
  0x3c   : > { %p31_p9 = scmp.ge.s32.totalorder %s29_s5, 2  ;;  %p43_p8 = scmp.ne.s32.totalorder %s841_s14, %s837_s13 }
  0x3d   : > { %p44_p1 = scmp.eq.s32.totalorder %s853_s17, 0  ;;  %p655_p4 = scmp.lt.s32.totalorder %s853_s17, 2 }
  0x3e   : > { %s1101_s5 = smov (%p31_p9, %s29_s5), 0  ;;  %s176_s24 = sand.u32 1, %s841_s14  }
  0x3f   : > { %p45_p5 = por %p44_p1, %p43_p8  ;;  %s33_s7 = ssub.s32 %s849_s16, %s1101_s5 }
  0x40   : > { %p34_p10 = scmp.eq.s32.totalorder %s33_s7, 0  ;;  %s524_s10 = sshll.u32 %s176_s24, 3 }
  0x41   : > { %s525_s11 = sshll.u32 %s849_s16, 7  ;;  %s180_s9 = scalar_lea.vmem [#allocation3], %s524_s10 }
  0x42   : > { %s999_s12 = scalar_select %p34_p10, %s841_s14, %s36_s6  }
  0x43   : > { %s1004_s8 = scalar_lea.hbm %s1078_s0, %s525_s11  ;;  %s187_s22 = sshll.u32 %s180_s9, 4  ;;  %s1006_s22 = int_to_ptr.vmem [resolvable:$true] %s187_s22 }
  0x44   : > { %p1010_p7 = pnand %p655_p4, %p45_p5  ;;  %s177_s27 = scalar_lea.sflag [#allocation4], %s176_s24 }
  0x45   : > { %s769_s28 = scalar_lea.hbm %s1004_s8, 128  ;;  %s774_s30 = scalar_lea.hbm %s1078_s0, 256 }
  0x46   : > { %p770_p11 = scmp.ne.s32.totalorder %s1004_s8, %s769_s28  ;;  %p771_p12 = pneg %p1010_p7 }
  0x47   : > { %p775_p2 = scmp.lt.u32.totalorder %s1004_s8, %s1078_s0  ;;  %p776_p3 = scmp.lt.u32.totalorder %s774_s30, %s769_s28 }
  0x48   : > { %p772_p13 = pnand %p771_p12, %p770_p11  ;;  %p778_p9 = scmp.lt.u32.totalorder %s769_s28, %s1004_s8 }
  0x49   : > { %p777_p6 = por %p776_p3, %p775_p2 }
  0x4a   : > { %p773_p0 = pneg %p772_p13 }
  0x4b   : > { %p779_p8 = por %p778_p9, %p777_p6 }
  0x4d   : > { %p780_p1 = pnand %p779_p8, %p773_p0 }
  0x4f   : > { %783 = shalt.err (!%p780_p1)
}
  0x50   : > { %s784_s24 = scalar_lea.vmem %s1006_s22, 128  ;;  %s859_s7 = smov [#allocation3]  }
  0x51   : > { %p785_p4 = scmp.ne.s32.totalorder %s1006_s22, %s784_s24  ;;  %s789_s10 = sshll.u32 %s859_s7, 4  ;;  %s790_s10 = int_to_ptr.vmem [resolvable:$false] %s789_s10 }
  0x52   : > { %s791_s11 = scalar_lea.vmem %s790_s10, 256  ;;  %p792_p11 = scmp.lt.s32.totalorder %s1006_s22, %s790_s10 }
  0x53   : > { %p787_p5 = pnand %p785_p4, %p771_p12  ;;  %p793_p13 = scmp.lt.s32.totalorder %s791_s11, %s784_s24 }
  0x55   : > { %p788_p10 = pneg %p787_p5  ;;  %p794_p2 = por %p793_p13, %p792_p11 }
  0x57   : > { %p795_p3 = pnand %p794_p2, %p788_p10 }
  0x59   : > { %798 = shalt.err (!%p795_p3)
}
  0x5a   : > { %652 = dma.hbm_to_vmem [thread:$0]  (!%p1010_p7), %s1004_s8, 128, %s1006_s22, %s177_s27  }
  0x5b   : > { %p1091_p0 = scmp.ne.s32.totalorder %s1088_s21, 0 }
  0x5c   : > { %s198_s18 = sand.u32 (!%p1091_p0), 1, %s837_s13   ;;  %p1092_p12 = scmp.ne.s32.totalorder (!%p1091_p0), %s1087_s20, 0 }
  0x5d   : > { %196 = sbr.rel (%p1091_p0) target bundleno = 540 (0x21c), region = 32  ;;  %s1042_s26 = sshll.u32 (!%p1091_p0), %s198_s18, 3 }
  0x5e   : > { %s199_s9 = scalar_lea.sflag (!%p1091_p0), [#allocation4], %s198_s18  ;;  %s202_s28 = scalar_lea.vmem (!%p1091_p0), [#allocation3], %s1042_s26 }
  0x64   : > { %824 = dma.done.wait (%p1092_p12), %s199_s9, 128  }
  0x65   : > { %826 = vsyncadd (%p1092_p12), %s199_s9, 4294967168  ;;  %p1093_p6 = scmp.ne.s32.totalorder %s1086_s19, 0 }
  0x67   : > { %828 = dma.done.wait (%p1093_p6), [#allocation6], 2560  }
  0x68   : > { %830 = vsyncadd (%p1093_p6), [#allocation6], 4294964736  ;;  %v860_v0 = vmov 0.0|0.0   ;;  %vm861_vm0 = vmmov 0   ;;  %v862_v1 = vmov 0.0   ;;  %v247_v2 = vld [vmem:[#allocation5] sm:$0xff] }
  0x69   : > { %602 = vmatprep.subr.bf16.mxu0 %v860_v0  ;;  %564 = vmatprep.mubr.msk.f32.mxu0 %vm861_vm0, %v862_v1  ;;  %v248_v3 = vld [vmem:[#allocation5 + $0x8] sm:$0xff]  ;;  %v249_v4 = vld [vmem:[#allocation5 + $0x10] sm:$0xff]  ;;  %v250_v6 = vld [vmem:[#allocation5 + $0x18] sm:$0xff]  ;;  %vm251_vm1 = vcmask 261120   ;;  %p235_p7 = scmp.lt.s32.totalorder %s845_s15, 1 }
  0x6a   : > { %608 = vmatprep.subr.bf16.mxu1 %v860_v0  ;;  %599 = vmatprep.mubr.msk.f32.mxu1 %vm861_vm0, %v862_v1  ;;  %v603_v5 = vpack.c.bf16 %v248_v3, %v247_v2  ;;  %v327_v7 = vld [vmem:[#allocation7] sm:$0xff]  ;;  %v328_v8 = vld [vmem:[#allocation7 + $0x8] sm:$0xff]  ;;  %v329_v9 = vld [vmem:[#allocation7 + $0x10] sm:$0xff]  ;;  %v606_v11 = vpack.c.bf16 %v250_v6, %v249_v4 }
  0x6b   : > { %v330_v10 = vld [vmem:[#allocation7 + $0x18] sm:$0xff]  ;;  %v609_v12 = vpack.c.bf16 %v328_v8, %v327_v7  ;;  %v331_v14 = vld [vmem:[#allocation7 + $0x20] sm:$0xff]  ;;  %v332_v15 = vld [vmem:[#allocation7 + $0x28] sm:$0xff]  ;;  %s1103_s15 = smov (!%p235_p7, %s845_s15), 1 }
  0x6c   : > { %604 = vmatpush3.bf16.msra.mxu0 %v603_v5  ;;  %v612_v13 = vpack.c.bf16 %v330_v10, %v329_v9  ;;  %v246_v16 = vld [vmem:[%s202_s28] sm:$0xff]  ;;  %v615_v17 = vpack.c.bf16 %v332_v15, %v331_v14  ;;  %v335_v21 = vld [vmem:[#allocation7 + $0x40] sm:$0xff]  ;;  %v336_v22 = vld [vmem:[#allocation7 + $0x48] sm:$0xff]  ;;  %s530_s19 = sshll.u32 %s1103_s15, 3 }
  0x6d   : > { %605 = vmatprep.subr.bf16.mxu0 %v860_v0  ;;  %610 = vmatpush3.bf16.msra.mxu1 %v609_v12  ;;  %v333_v18 = vld [vmem:[#allocation7 + $0x30] sm:$0xff]  ;;  %v334_v19 = vld [vmem:[#allocation7 + $0x38] sm:$0xff]  ;;  %v621_v23 = vpack.c.bf16 %v336_v22, %v335_v21  ;;  %v339_v27 = vld [vmem:[#allocation7 + $0x60] sm:$0xff]  ;;  %s241_s8 = scalar_lea.vmem %s1081_s3, %s530_s19 }
  0x6e   : > { %611 = vmatprep.subr.bf16.mxu1 %v860_v0  ;;  %v618_v20 = vpack.c.bf16 %v334_v19, %v333_v18  ;;  %v337_v24 = vld [vmem:[#allocation7 + $0x50] sm:$0xff]  ;;  %v338_v25 = vld [vmem:[#allocation7 + $0x58] sm:$0xff]  ;;  %v340_v28 = vld [vmem:[#allocation7 + $0x68] sm:$0xff] }
  0x6f   : > { %v624_v26 = vpack.c.bf16 %v338_v25, %v337_v24  ;;  %v627_v29 = vpack.c.bf16 %v340_v28, %v339_v27  ;;  %v341_v30 = vld [vmem:[#allocation7 + $0x70] sm:$0xff]  ;;  %v342_v31 = vld [vmem:[#allocation7 + $0x78] sm:$0xff] }
  0x70   : > { %607 = vmatpush3.bf16.msra.mxu0 %v606_v11  ;;  %v630_v32 = vpack.c.bf16 %v342_v31, %v341_v30 }
  0x71   : > { %613 = vmatpush3.bf16.msra.mxu1 %v612_v13 }
  0x72   : > { %614 = vmatprep.subr.bf16.mxu1 %v860_v0 }
  0x73   : > { %565 = vmatmul.mubr.msk.f32.vlgmr.msra.gmra.mrb[0].mxu0 %vm251_vm1, %v246_v16 }
  0x75   : > { %616 = vmatpush3.bf16.msra.mxu1 %v615_v17 }
  0x76   : > { %617 = vmatprep.subr.bf16.mxu1 %v860_v0 }
  0x79   : > { %619 = vmatpush3.bf16.msra.mxu1 %v618_v20 }
  0x7a   : > { %620 = vmatprep.subr.bf16.mxu1 %v860_v0 }
  0x7d   : > { %622 = vmatpush3.bf16.msra.mxu1 %v621_v23 }
  0x7e   : > { %623 = vmatprep.subr.bf16.mxu1 %v860_v0 }
  0x81   : > { %625 = vmatpush3.bf16.msra.mxu1 %v624_v26 }
  0x82   : > { %626 = vmatprep.subr.bf16.mxu1 %v860_v0 }
  0x85   : > { %628 = vmatpush3.bf16.msra.mxu1 %v627_v29 }
  0x86   : > { %629 = vmatprep.subr.bf16.mxu1 %v860_v0 }
  0x89   : > { %631 = vmatpush3.bf16.msra.mxu1 %v630_v32 }
 0x146   : > { %v321_v33 = vpop.f32.mrb[0].mxu0 }
 0x147   : > { %v566_v34 = vpop.f32.mrb[1].mxu0  ;;  %600 = vmatmul.mubr.f32.vlgmr.msra.gmra.mrb[0].mxu1 %v321_v33 }
 0x21a   : > { %v409_v35 = vpop.f32.mrb[0].mxu1 }
 0x21b   : > { %413 = vst [vmem:[%s241_s8] sm:$0xff] %v409_v35  ;;  %v601_v36 = vpop.f32.mrb[1].mxu1 }
 0x21c PF: > { %s17_s17 = sadd.s32 1, %s853_s17   ;;  %s1094_s22 = smov %s999_s12 }
 0x21d   : > { %p14_p9 = scmp.ge.s32.totalorder %s17_s17, 4   ;;  %s1095_s12 = smov %s837_s13 }
 0x21e   : > { %s1096_s13 = smov %s841_s14  ;;  %s1097_s14 = smov %s1094_s22 }
 0x21f   : > { %s1098_s15 = smov %s849_s16  ;;  %s1099_s16 = smov %s1101_s5 }
 0x220   :  { %16 = sbr.rel (!%p14_p9) target bundleno = 5 (0x5), region = 85 }
 0x227   :  { %439 = vsyncpa [#allocation4], 1 }
 0x228   :  { %441 = vsyncpa [#allocation4 + $0x1], 1 }
 0x229   :  { %442 = vsyncpa [#allocation6], 1 }

// kernel: _forward_impl.1
= control target key start
LH: loop header
LB: loop body
LE: loop exit
PB: predicated region body
PF: predicated region fallthrough
CT: control target
= control target key end

     0   :  { %8 = vsyncpa [#allocation4], 0  ;;  %s1078_s0 = inlined_call_operand.hbm [shape: f32[16,32], index: 0, kind: input, shape index: {}]   ;;  %s1079_s1 = inlined_call_operand.hbm [shape: f32[32,128], index: 1, kind: input, shape index: {}]   ;;  %s1080_s2 = inlined_call_operand.hbm [shape: f32[128,128], index: 2, kind: input, shape index: {}]   ;;  %s1081_s3 = inlined_call_operand.vmem [shape: f32[16,128], index: 3, kind: output, shape index: {}]  }
   0x1   :  { %10 = vsyncpa [#allocation4 + $0x1], 0 }
   0x2   :  { %11 = vsyncpa [#allocation6], 0  ;;  %s883_s12 = smov 0   ;;  %s885_s13 = smov 0  }
   0x3   :  { %s887_s14 = smov 0   ;;  %s889_s15 = smov 0  }
   0x4   :  { %s891_s16 = smov 0   ;;  %s893_s17 = smov 0  }
   0x5 LB: > { %s518_s18 = sadd.s32 4294967295, %s853_s17   ;;  %p49_p0 = scmp.ne.s32.totalorder %s837_s13, %s833_s12  ;;  %s853_s17 = sphi %s893_s17, %s17_s17   ;;  %s849_s16 = sphi %s891_s16, %s1099_s16   ;;  %s845_s15 = sphi %s889_s15, %s1098_s15   ;;  %s841_s14 = sphi %s887_s14, %s1097_s14   ;;  %s837_s13 = sphi %s885_s13, %s1096_s13   ;;  %s833_s12 = sphi %s883_s12, %s1095_s12  }
   0x6   : > { %p913_p1 = scmp.eq.s32.totalorder %s518_s18, 0  ;;  %p520_p2 = scmp.ge.s32.totalorder %s853_s17, 1 }
   0x7   : > { %p135_p3 = scmp.lt.s32.totalorder %s853_s17, 3  ;;  %s855_s22 = smov [#allocation5]  }
   0x8   : > { %s1086_s19 = scalar_select %p913_p1, 1, 0 }
   0x9   : > { %p921_p4 = por %p913_p1, %p49_p0  ;;  %p925_p5 = pnand %p520_p2, %p135_p3 }
   0xa   : > { %s147_s23 = sshll.u32 %s855_s22, 4  ;;  %s856_s25 = smov [#allocation7]   ;;  %s148_s23 = int_to_ptr.vmem [resolvable:$true] %s147_s23 }
   0xb   : > { %s1087_s20 = scalar_select %p921_p4, 1, 0 }
   0xc   : > { %s1088_s21 = scalar_select %p925_p5, 1, 0 }
   0xd   : > { %p642_p6 = pneg %p925_p5  ;;  %s162_s26 = sshll.u32 %s856_s25, 4  ;;  %s937_s26 = int_to_ptr.vmem [resolvable:$true] %s162_s26 }
   0xe   : > { %s713_s29 = scalar_lea.hbm %s1079_s1, 512 }
   0xf   : > { %p933_p7 = pnand %p642_p6, %p913_p1  ;;  %p714_p8 = scmp.ne.s32.totalorder %s1079_s1, %s713_s29 }
  0x10   : > { %p720_p12 = scmp.lt.u32.totalorder %s713_s29, %s1079_s1 }
  0x11   : > { %p715_p9 = pneg %p933_p7 }
  0x13   : > { %p716_p10 = pnand %p715_p9, %p714_p8 }
  0x15   : > { %p717_p11 = pneg %p716_p10 }
  0x17   : > { %p722_p13 = pnand %p720_p12, %p717_p11 }
  0x19   : > { %725 = shalt.err (!%p722_p13)
}
  0x1a   : > { %s726_s7 = scalar_lea.vmem %s148_s23, 512  ;;  %p734_p6 = scmp.lt.s32.totalorder %s148_s23, %s148_s23 }
  0x1b   : > { %p727_p0 = scmp.ne.s32.totalorder %s148_s23, %s726_s7  ;;  %p735_p1 = scmp.lt.s32.totalorder %s726_s7, %s726_s7 }
  0x1d   : > { %p729_p2 = pnand %p727_p0, %p715_p9  ;;  %p736_p4 = por %p735_p1, %p734_p6 }
  0x1f   : > { %p730_p3 = pneg %p729_p2 }
  0x21   : > { %p737_p5 = pnand %p736_p4, %p730_p3 }
  0x23   : > { %740 = shalt.err (!%p737_p5)
}
  0x24   : > { %s857_s8 = smov 128   ;;  %s858_s9 = smov 8  }
  0x25   : > { %645 = dma.hbm_to_vmem [thread:$0]  (!%p933_p7), %s1079_s1, 512, %s148_s23, [#allocation6], %s857_s8, %s857_s8, %s858_s9  }
  0x26   : > { %s741_s22 = scalar_lea.hbm %s1080_s2, 2048 }
  0x27   : > { %p742_p8 = scmp.ne.s32.totalorder %s1080_s2, %s741_s22  ;;  %p748_p5 = scmp.lt.u32.totalorder %s741_s22, %s1080_s2 }
  0x29   : > { %p744_p1 = pnand %p742_p8, %p715_p9 }
  0x2b   : > { %p745_p4 = pneg %p744_p1 }
  0x2d   : > { %p750_p10 = pnand %p748_p5, %p745_p4 }
  0x2f   : > { %753 = shalt.err (!%p750_p10)
}
  0x30   : > { %s754_s23 = scalar_lea.vmem %s937_s26, 2048  ;;  %p762_p0 = scmp.lt.s32.totalorder %s937_s26, %s937_s26 }
  0x31   : > { %p755_p11 = scmp.ne.s32.totalorder %s937_s26, %s754_s23  ;;  %p763_p2 = scmp.lt.s32.totalorder %s754_s23, %s754_s23 }
  0x33   : > { %p757_p12 = pnand %p755_p11, %p715_p9  ;;  %p764_p3 = por %p763_p2, %p762_p0 }
  0x35   : > { %p758_p13 = pneg %p757_p12 }
  0x37   : > { %p765_p6 = pnand %p764_p3, %p758_p13 }
  0x39   : > { %768 = shalt.err (!%p765_p6)
}
  0x3a   : > { %648 = dma.hbm_to_vmem [thread:$0]  (!%p933_p7), %s1080_s2, 2048, %s937_s26, [#allocation6], %s857_s8, %s857_s8, %s858_s9  }
  0x3b   : > { %s29_s5 = sadd.s32 1, %s849_s16  ;;  %s36_s6 = sadd.s32 1, %s841_s14 }
  0x3c   : > { %p31_p9 = scmp.ge.s32.totalorder %s29_s5, 2  ;;  %p43_p8 = scmp.ne.s32.totalorder %s841_s14, %s837_s13 }
  0x3d   : > { %p44_p1 = scmp.eq.s32.totalorder %s853_s17, 0  ;;  %p655_p4 = scmp.lt.s32.totalorder %s853_s17, 2 }
  0x3e   : > { %s1101_s5 = smov (%p31_p9, %s29_s5), 0  ;;  %s176_s24 = sand.u32 1, %s841_s14  }
  0x3f   : > { %p45_p5 = por %p44_p1, %p43_p8  ;;  %s33_s7 = ssub.s32 %s849_s16, %s1101_s5 }
  0x40   : > { %p34_p10 = scmp.eq.s32.totalorder %s33_s7, 0  ;;  %s524_s10 = sshll.u32 %s176_s24, 3 }
  0x41   : > { %s525_s11 = sshll.u32 %s849_s16, 7  ;;  %s180_s9 = scalar_lea.vmem [#allocation3], %s524_s10 }
  0x42   : > { %s999_s12 = scalar_select %p34_p10, %s841_s14, %s36_s6  }
  0x43   : > { %s1004_s8 = scalar_lea.hbm %s1078_s0, %s525_s11  ;;  %s187_s22 = sshll.u32 %s180_s9, 4  ;;  %s1006_s22 = int_to_ptr.vmem [resolvable:$true] %s187_s22 }
  0x44   : > { %p1010_p7 = pnand %p655_p4, %p45_p5  ;;  %s177_s27 = scalar_lea.sflag [#allocation4], %s176_s24 }
  0x45   : > { %s769_s28 = scalar_lea.hbm %s1004_s8, 128  ;;  %s774_s30 = scalar_lea.hbm %s1078_s0, 256 }
  0x46   : > { %p770_p11 = scmp.ne.s32.totalorder %s1004_s8, %s769_s28  ;;  %p771_p12 = pneg %p1010_p7 }
  0x47   : > { %p775_p2 = scmp.lt.u32.totalorder %s1004_s8, %s1078_s0  ;;  %p776_p3 = scmp.lt.u32.totalorder %s774_s30, %s769_s28 }
  0x48   : > { %p772_p13 = pnand %p771_p12, %p770_p11  ;;  %p778_p9 = scmp.lt.u32.totalorder %s769_s28, %s1004_s8 }
  0x49   : > { %p777_p6 = por %p776_p3, %p775_p2 }
  0x4a   : > { %p773_p0 = pneg %p772_p13 }
  0x4b   : > { %p779_p8 = por %p778_p9, %p777_p6 }
  0x4d   : > { %p780_p1 = pnand %p779_p8, %p773_p0 }
  0x4f   : > { %783 = shalt.err (!%p780_p1)
}
  0x50   : > { %s784_s24 = scalar_lea.vmem %s1006_s22, 128  ;;  %s859_s7 = smov [#allocation3]  }
  0x51   : > { %p785_p4 = scmp.ne.s32.totalorder %s1006_s22, %s784_s24  ;;  %s789_s10 = sshll.u32 %s859_s7, 4  ;;  %s790_s10 = int_to_ptr.vmem [resolvable:$false] %s789_s10 }
  0x52   : > { %s791_s11 = scalar_lea.vmem %s790_s10, 256  ;;  %p792_p11 = scmp.lt.s32.totalorder %s1006_s22, %s790_s10 }
  0x53   : > { %p787_p5 = pnand %p785_p4, %p771_p12  ;;  %p793_p13 = scmp.lt.s32.totalorder %s791_s11, %s784_s24 }
  0x55   : > { %p788_p10 = pneg %p787_p5  ;;  %p794_p2 = por %p793_p13, %p792_p11 }
  0x57   : > { %p795_p3 = pnand %p794_p2, %p788_p10 }
  0x59   : > { %798 = shalt.err (!%p795_p3)
}
  0x5a   : > { %652 = dma.hbm_to_vmem [thread:$0]  (!%p1010_p7), %s1004_s8, 128, %s1006_s22, %s177_s27  }
  0x5b   : > { %p1091_p0 = scmp.ne.s32.totalorder %s1088_s21, 0 }
  0x5c   : > { %s198_s18 = sand.u32 (!%p1091_p0), 1, %s837_s13   ;;  %p1092_p12 = scmp.ne.s32.totalorder (!%p1091_p0), %s1087_s20, 0 }
  0x5d   : > { %196 = sbr.rel (%p1091_p0) target bundleno = 540 (0x21c), region = 32  ;;  %s1042_s26 = sshll.u32 (!%p1091_p0), %s198_s18, 3 }
  0x5e   : > { %s199_s9 = scalar_lea.sflag (!%p1091_p0), [#allocation4], %s198_s18  ;;  %s202_s28 = scalar_lea.vmem (!%p1091_p0), [#allocation3], %s1042_s26 }
  0x64   : > { %824 = dma.done.wait (%p1092_p12), %s199_s9, 128  }
  0x65   : > { %826 = vsyncadd (%p1092_p12), %s199_s9, 4294967168  ;;  %p1093_p6 = scmp.ne.s32.totalorder %s1086_s19, 0 }
  0x67   : > { %828 = dma.done.wait (%p1093_p6), [#allocation6], 2560  }
  0x68   : > { %830 = vsyncadd (%p1093_p6), [#allocation6], 4294964736  ;;  %v860_v0 = vmov 0.0|0.0   ;;  %vm861_vm0 = vmmov 0   ;;  %v862_v1 = vmov 0.0   ;;  %v247_v2 = vld [vmem:[#allocation5] sm:$0xff] }
  0x69   : > { %602 = vmatprep.subr.bf16.mxu0 %v860_v0  ;;  %564 = vmatprep.mubr.msk.f32.mxu0 %vm861_vm0, %v862_v1  ;;  %v248_v3 = vld [vmem:[#allocation5 + $0x8] sm:$0xff]  ;;  %v249_v4 = vld [vmem:[#allocation5 + $0x10] sm:$0xff]  ;;  %v250_v6 = vld [vmem:[#allocation5 + $0x18] sm:$0xff]  ;;  %vm251_vm1 = vcmask 261120   ;;  %p235_p7 = scmp.lt.s32.totalorder %s845_s15, 1 }
  0x6a   : > { %608 = vmatprep.subr.bf16.mxu1 %v860_v0  ;;  %599 = vmatprep.mubr.msk.f32.mxu1 %vm861_vm0, %v862_v1  ;;  %v603_v5 = vpack.c.bf16 %v248_v3, %v247_v2  ;;  %v327_v7 = vld [vmem:[#allocation7] sm:$0xff]  ;;  %v328_v8 = vld [vmem:[#allocation7 + $0x8] sm:$0xff]  ;;  %v329_v9 = vld [vmem:[#allocation7 + $0x10] sm:$0xff]  ;;  %v606_v11 = vpack.c.bf16 %v250_v6, %v249_v4 }
  0x6b   : > { %v330_v10 = vld [vmem:[#allocation7 + $0x18] sm:$0xff]  ;;  %v609_v12 = vpack.c.bf16 %v328_v8, %v327_v7  ;;  %v331_v14 = vld [vmem:[#allocation7 + $0x20] sm:$0xff]  ;;  %v332_v15 = vld [vmem:[#allocation7 + $0x28] sm:$0xff]  ;;  %s1103_s15 = smov (!%p235_p7, %s845_s15), 1 }
  0x6c   : > { %604 = vmatpush3.bf16.msra.mxu0 %v603_v5  ;;  %v612_v13 = vpack.c.bf16 %v330_v10, %v329_v9  ;;  %v246_v16 = vld [vmem:[%s202_s28] sm:$0xff]  ;;  %v615_v17 = vpack.c.bf16 %v332_v15, %v331_v14  ;;  %v335_v21 = vld [vmem:[#allocation7 + $0x40] sm:$0xff]  ;;  %v336_v22 = vld [vmem:[#allocation7 + $0x48] sm:$0xff]  ;;  %s530_s19 = sshll.u32 %s1103_s15, 3 }
  0x6d   : > { %605 = vmatprep.subr.bf16.mxu0 %v860_v0  ;;  %610 = vmatpush3.bf16.msra.mxu1 %v609_v12  ;;  %v333_v18 = vld [vmem:[#allocation7 + $0x30] sm:$0xff]  ;;  %v334_v19 = vld [vmem:[#allocation7 + $0x38] sm:$0xff]  ;;  %v621_v23 = vpack.c.bf16 %v336_v22, %v335_v21  ;;  %v339_v27 = vld [vmem:[#allocation7 + $0x60] sm:$0xff]  ;;  %s241_s8 = scalar_lea.vmem %s1081_s3, %s530_s19 }
  0x6e   : > { %611 = vmatprep.subr.bf16.mxu1 %v860_v0  ;;  %v618_v20 = vpack.c.bf16 %v334_v19, %v333_v18  ;;  %v337_v24 = vld [vmem:[#allocation7 + $0x50] sm:$0xff]  ;;  %v338_v25 = vld [vmem:[#allocation7 + $0x58] sm:$0xff]  ;;  %v340_v28 = vld [vmem:[#allocation7 + $0x68] sm:$0xff] }
  0x6f   : > { %v624_v26 = vpack.c.bf16 %v338_v25, %v337_v24  ;;  %v627_v29 = vpack.c.bf16 %v340_v28, %v339_v27  ;;  %v341_v30 = vld [vmem:[#allocation7 + $0x70] sm:$0xff]  ;;  %v342_v31 = vld [vmem:[#allocation7 + $0x78] sm:$0xff] }
  0x70   : > { %607 = vmatpush3.bf16.msra.mxu0 %v606_v11  ;;  %v630_v32 = vpack.c.bf16 %v342_v31, %v341_v30 }
  0x71   : > { %613 = vmatpush3.bf16.msra.mxu1 %v612_v13 }
  0x72   : > { %614 = vmatprep.subr.bf16.mxu1 %v860_v0 }
  0x73   : > { %565 = vmatmul.mubr.msk.f32.vlgmr.msra.gmra.mrb[0].mxu0 %vm251_vm1, %v246_v16 }
  0x75   : > { %616 = vmatpush3.bf16.msra.mxu1 %v615_v17 }
  0x76   : > { %617 = vmatprep.subr.bf16.mxu1 %v860_v0 }
  0x79   : > { %619 = vmatpush3.bf16.msra.mxu1 %v618_v20 }
  0x7a   : > { %620 = vmatprep.subr.bf16.mxu1 %v860_v0 }
  0x7d   : > { %622 = vmatpush3.bf16.msra.mxu1 %v621_v23 }
  0x7e   : > { %623 = vmatprep.subr.bf16.mxu1 %v860_v0 }
  0x81   : > { %625 = vmatpush3.bf16.msra.mxu1 %v624_v26 }
  0x82   : > { %626 = vmatprep.subr.bf16.mxu1 %v860_v0 }
  0x85   : > { %628 = vmatpush3.bf16.msra.mxu1 %v627_v29 }
  0x86   : > { %629 = vmatprep.subr.bf16.mxu1 %v860_v0 }
  0x89   : > { %631 = vmatpush3.bf16.msra.mxu1 %v630_v32 }
 0x146   : > { %v321_v33 = vpop.f32.mrb[0].mxu0 }
 0x147   : > { %v566_v34 = vpop.f32.mrb[1].mxu0  ;;  %600 = vmatmul.mubr.f32.vlgmr.msra.gmra.mrb[0].mxu1 %v321_v33 }
 0x21a   : > { %v409_v35 = vpop.f32.mrb[0].mxu1 }
 0x21b   : > { %413 = vst [vmem:[%s241_s8] sm:$0xff] %v409_v35  ;;  %v601_v36 = vpop.f32.mrb[1].mxu1 }
 0x21c PF: > { %s17_s17 = sadd.s32 1, %s853_s17   ;;  %s1094_s22 = smov %s999_s12 }
 0x21d   : > { %p14_p9 = scmp.ge.s32.totalorder %s17_s17, 4   ;;  %s1095_s12 = smov %s837_s13 }
 0x21e   : > { %s1096_s13 = smov %s841_s14  ;;  %s1097_s14 = smov %s1094_s22 }
 0x21f   : > { %s1098_s15 = smov %s849_s16  ;;  %s1099_s16 = smov %s1101_s5 }
 0x220   :  { %16 = sbr.rel (!%p14_p9) target bundleno = 5 (0x5), region = 85 }
 0x227   :  { %439 = vsyncpa [#allocation4], 1 }
 0x228   :  { %441 = vsyncpa [#allocation4 + $0x1], 1 }
 0x229   :  { %442 = vsyncpa [#allocation6], 1 }

</bundles_post_ra>
